<compile_context>
chip_gen: v6e
topology: v6e:2x2x1
jax: 0.10.0
libtpu: 0.0.40
codegen_flags: <defaults>
</compile_context>

<pallas_src>
import functools

import jax
import jax.numpy as jnp
from jax import lax
from jax.experimental import pallas as pl
from jax.experimental.pallas import tpu as pltpu


def _poscnn_kernel(x_ref, top_ref, bot_ref, w_ref, b_ref, o_ref, *, valid_h):
    """Depthwise 3x3 conv (pad=1, stride=1) + bias + residual for one H-strip.

    x_ref   : (1, TH, W, C)  current row strip
    top_ref : (1, 1,  W, C)  row just above the strip (clamped; masked at hi==0)
    bot_ref : (1, 1,  W, C)  row just below the strip (clamped; masked at last)
    w_ref   : (3, 3, C)      depthwise taps w[kh, kw, c]
    b_ref   : (1, 1, C)      bias
    o_ref   : (1, TH, W, C)  output strip
    """
    _, TH, W, C = x_ref.shape
    hi = pl.program_id(1)
    nh = pl.num_programs(1)
    f32 = jnp.float32

    x = x_ref[0].astype(f32)                         # (TH, W, C), cast once
    zrow = jnp.zeros((1, W, C), f32)

    # Halo rows: rows outside the image contribute zeros (conv padding = 1).
    # jnp.where (select) rather than multiply, so Inf/NaN in the clamped edge
    # row cannot leak into the first/last strip rows.
    top = jnp.where(hi > 0, top_ref[0].astype(f32), zrow)       # (1, W, C)
    bot = jnp.where(hi < nh - 1, bot_ref[0].astype(f32), zrow)  # (1, W, C)

    # Ragged tail (TH does not divide H): rows past the image are unspecified,
    # zero them so they cannot pollute the last valid row's kh=2 tap.
    if valid_h % TH != 0:
        row = lax.broadcasted_iota(jnp.int32, (TH, 1, 1), 0)
        x = jnp.where(hi * TH + row < valid_h, x, 0.0)

    # Single (TH+2)-row vertical window -- the only strip-sized copy in the
    # kernel.  All axis-0 slices of it below are free views.
    xv = jnp.concatenate([top, x, bot], axis=0)      # (TH+2, W, C) f32

    # Width-shifted views via XLU roll + edge masks (no concat copies).
    col = lax.broadcasted_iota(jnp.int32, (1, W, 1), 1)
    x_wm1 = jnp.where(col >= 1, pltpu.roll(xv, 1, axis=1), 0.0)      # value at w-1
    x_wp1 = jnp.where(col <= W - 2, pltpu.roll(xv, W - 1, axis=1), 0.0)  # value at w+1
    views = (x_wm1, xv, x_wp1)                       # kw = 0, 1, 2

    w = w_ref[...].astype(f32)                       # (3, 3, C), loaded once
    b = b_ref[0].astype(f32)                         # (1, C)

    # Residual (s == 1 path) + bias; accumulate the 9 taps in f32.
    acc = xv[1:TH + 1] + b                           # (TH, W, C)
    for kh in range(3):
        for kw in range(3):
            acc = acc + views[kw][kh:kh + TH] * w[kh, kw]
    o_ref[0] = acc.astype(o_ref.dtype)


def _vmem_capacity_bytes(default=64 << 20):
    """Physical VMEM bytes of the current chip (conservative fallback)."""
    try:
        cap = getattr(pltpu.get_tpu_info(), "vmem_capacity_bytes", None)
        if cap:
            return int(cap)
    except Exception:
        pass
    return default


def _pick_strip_rows(H, W, C, itemsize, budget_bytes, want_multi_strip=False):
    """Largest strip height fitting the VMEM budget; prefers exact divisors of H."""
    def fits(th):
        interm = 5 * (th + 2) * W * C * 4            # f32 window / shifts / acc
        blocks = 4 * th * W * C * itemsize           # double-buffered in+out tiles
        return interm + blocks <= budget_bytes

    max_th = max((th for th in range(1, H + 1) if fits(th)), default=1)
    if want_multi_strip:                             # keep >= 2 strips (v7x: 2 TCs)
        max_th = min(max_th, max(1, pl.cdiv(H, 2)))
    # Prefer an exact divisor of H (no ragged tail) unless it would more than
    # halve the strip size the budget allows.
    best_div = max((d for d in range(1, max_th + 1) if H % d == 0), default=1)
    return best_div if 2 * best_div >= max_th else max_th


def pos_cnn_forward(x, hw_shape, weight, bias, s=1, strip_rows=None):
    """PosCNN forward.  x: (B, N, C); weight: (3, 3, C); bias: (C,) -> (B, N, C).

    NOTE: PyTorch's depthwise weight has shape (C, 1, 3, 3); the (3, 3, C) layout
    used here is w.squeeze(1).permute(1, 2, 0).
    """
    # TODO(synk): s != 1 path (strided conv, no residual) not implemented.
    assert s == 1, "only the s=1 (residual) path is implemented"
    H, W = hw_shape
    B, N, C = x.shape
    assert N == H * W
    # TODO(synk): for C % 128 != 0 (lane-sparse channels) fold width columns into
    # the lane axis ((W, C) -> (W//k, k*C)); as-is such shapes use masked stores.

    x_nhwc = x.reshape(B, H, W, C)          # bitcast-compatible reshape (free)
    bias_r = bias.reshape(1, 1, C)
    itemsize = x.dtype.itemsize

    vmem_limit = min((_vmem_capacity_bytes() * 3) // 4, 96 << 20)
    if strip_rows is None:
        TH = _pick_strip_rows(H, W, C, itemsize, vmem_limit // 2,
                              want_multi_strip=(B == 1))
    else:
        TH = int(strip_rows)
    nh = pl.cdiv(H, TH)

    cost = pl.CostEstimate(
        flops=20 * B * H * W * C,                 # 9 mul + 9 add + bias + residual
        transcendentals=0,
        bytes_accessed=(2 * B * H * W * C + 2 * B * nh * W * C) * itemsize
        + 10 * C * itemsize,
    )

    def strip_map(b, hi):
        return (b, hi, 0, 0)

    def top_map(b, hi):                      # element index (block size 1 along H)
        return (b, jnp.maximum(hi * TH - 1, 0), 0, 0)

    def bot_map(b, hi):
        return (b, jnp.minimum(hi * TH + TH, H - 1), 0, 0)

    out = pl.pallas_call(
        functools.partial(_poscnn_kernel, valid_h=H),
        out_shape=jax.ShapeDtypeStruct((B, H, W, C), x.dtype),
        grid_spec=pltpu.PrefetchScalarGridSpec(
            num_scalar_prefetch=0,
            grid=(B, nh),
            in_specs=[
                pl.BlockSpec((1, TH, W, C), strip_map),
                pl.BlockSpec((1, 1, W, C), top_map),
                pl.BlockSpec((1, 1, W, C), bot_map),
                pl.BlockSpec((3, 3, C), lambda b, hi: (0, 0, 0)),
                pl.BlockSpec((1, 1, C), lambda b, hi: (0, 0, 0)),
            ],
            out_specs=pl.BlockSpec((1, TH, W, C), strip_map),
        ),
        compiler_params=pltpu.CompilerParams(
            dimension_semantics=("parallel", "parallel"),
            vmem_limit_bytes=int(vmem_limit),
        ),
        cost_estimate=cost,
    )(x_nhwc, x_nhwc, x_nhwc, weight, bias_r)

    return out.reshape(B, N, C)


def _reference(x, hw_shape, weight, bias):
    """Pure-JAX reference: depthwise conv (NHWC) + bias + residual."""
    H, W = hw_shape
    B, N, C = x.shape
    x_nhwc = x.reshape(B, H, W, C)
    k = weight.reshape(3, 3, 1, C)            # HWIO, feature_group_count = C
    y = lax.conv_general_dilated(
        x_nhwc, k, window_strides=(1, 1), padding=((1, 1), (1, 1)),
        dimension_numbers=("NHWC", "HWIO", "NHWC"), feature_group_count=C)
    y = y + bias.reshape(1, 1, 1, C) + x_nhwc
    return y.reshape(B, N, C)


if __name__ == "__main__":
    key = jax.random.PRNGKey(0)
    kx, kw_, kb = jax.random.split(key, 3)

    # Small shapes consistent with the module (in_chans == embed_dim == C).
    # C is a multiple of 128 so the channel (lane) axis is dense.
    B, H, W, C = 2, 16, 16, 128
    N = H * W
    x = jax.random.normal(kx, (B, N, C), dtype=jnp.float32)
    # PyTorch weight is (C, 1, 3, 3); stored here as (3, 3, C) (a transpose).
    weight = jax.random.normal(kw_, (3, 3, C), dtype=jnp.float32) * 0.1
    bias = jax.random.normal(kb, (C,), dtype=jnp.float32) * 0.1

    ref = _reference(x, (H, W), weight, bias)

    # 1) Fixed strip_rows=4 -> grid (B, 4): exercises halo masking across strips.
    out = jax.block_until_ready(
        pos_cnn_forward(x, (H, W), weight, bias, s=1, strip_rows=4))
    assert out.shape == (B, N, C)
    assert jnp.allclose(out, ref, atol=1e-4, rtol=1e-4), "mismatch (strips)"

    # 2) VMEM-aware automatic strip selection.
    out2 = jax.block_until_ready(pos_cnn_forward(x, (H, W), weight, bias, s=1))
    assert jnp.allclose(out2, ref, atol=1e-4, rtol=1e-4), "mismatch (auto TH)"

    # 3) Ragged H (strips do not divide H) with B == 1.
    H2, W2 = 10, 16
    x2 = jax.random.normal(jax.random.fold_in(key, 1), (1, H2 * W2, C),
                           dtype=jnp.float32)
    out3 = jax.block_until_ready(
        pos_cnn_forward(x2, (H2, W2), weight, bias, s=1, strip_rows=4))
    ref3 = _reference(x2, (H2, W2), weight, bias)
    assert jnp.allclose(out3, ref3, atol=1e-4, rtol=1e-4), "mismatch (ragged H)"

    print("KERNEL_OK")
</pallas_src>

<mosaic_0001>
module attributes {stable_mosaic.version = 11 : i64} {
  func.func @_poscnn_kernel(%arg0: i32, %arg1: i32, %arg2: memref<1x4x16x128xf32, #tpu.memory_space<vmem>>, %arg3: memref<1x1x16x128xf32, #tpu.memory_space<vmem>>, %arg4: memref<1x1x16x128xf32, #tpu.memory_space<vmem>>, %arg5: memref<3x3x128xf32, #tpu.memory_space<vmem>>, %arg6: memref<1x1x128xf32, #tpu.memory_space<vmem>>, %arg7: memref<1x4x16x128xf32, #tpu.memory_space<vmem>>) attributes {dimension_semantics = [#tpu.dimension_semantics<parallel>, #tpu.dimension_semantics<parallel>], iteration_bounds = array<i64: 2, 4>, scalar_prefetch = 0 : i64, scratch_operands = 0 : i64, tpu.core_type = #tpu.core_type<tc>, window_params = [{transform_indices = @transform_0, window_bounds = array<i64: 1, 4, 16, 128>}, {transform_indices = @transform_1, window_bounds = array<i64: 1, 1, 16, 128>}, {transform_indices = @transform_2, window_bounds = array<i64: 1, 1, 16, 128>}, {pipeline_mode = #tpu.pipeline_mode<synchronous>, transform_indices = @transform_3, window_bounds = array<i64: 3, 3, 128>}, {pipeline_mode = #tpu.pipeline_mode<synchronous>, transform_indices = @transform_4, window_bounds = array<i64: 1, 1, 128>}, {transform_indices = @transform_5, window_bounds = array<i64: 1, 4, 16, 128>}]} {
    %c0 = arith.constant 0 : index
    %c0_0 = arith.constant 0 : index
    %c0_1 = arith.constant 0 : index
    %c0_2 = arith.constant 0 : index
    %0 = vector.load %arg2[%c0, %c0_0, %c0_1, %c0_2] : memref<1x4x16x128xf32, #tpu.memory_space<vmem>>, vector<1x4x16x128xf32>
    %1 = vector.shape_cast %0 : vector<1x4x16x128xf32> to vector<4x16x128xf32>
    %cst = arith.constant 0.000000e+00 : f32
    %2 = vector.broadcast %cst : f32 to vector<1x16x128xf32>
    %c0_i32 = arith.constant 0 : i32
    %3 = arith.cmpi sgt, %arg1, %c0_i32 : i32
    %c0_3 = arith.constant 0 : index
    %c0_4 = arith.constant 0 : index
    %c0_5 = arith.constant 0 : index
    %c0_6 = arith.constant 0 : index
    %4 = vector.load %arg3[%c0_3, %c0_4, %c0_5, %c0_6] : memref<1x1x16x128xf32, #tpu.memory_space<vmem>>, vector<1x1x16x128xf32>
    %5 = vector.shape_cast %4 : vector<1x1x16x128xf32> to vector<1x16x128xf32>
    %6 = arith.select %3, %5, %2 : vector<1x16x128xf32>
    %c3_i32 = arith.constant 3 : i32
    %7 = arith.cmpi slt, %arg1, %c3_i32 : i32
    %c0_7 = arith.constant 0 : index
    %c0_8 = arith.constant 0 : index
    %c0_9 = arith.constant 0 : index
    %c0_10 = arith.constant 0 : index
    %8 = vector.load %arg4[%c0_7, %c0_8, %c0_9, %c0_10] : memref<1x1x16x128xf32, #tpu.memory_space<vmem>>, vector<1x1x16x128xf32>
    %9 = vector.shape_cast %8 : vector<1x1x16x128xf32> to vector<1x16x128xf32>
    %10 = arith.select %7, %9, %2 : vector<1x16x128xf32>
    %11 = tpu.concatenate %6, %1, %10 in 0 : vector<1x16x128xf32>, vector<4x16x128xf32>, vector<1x16x128xf32> -> vector<6x16x128xf32>
    %12 = tpu.iota {dimensions = array<i32: 1>} : vector<1x16x1xi32>
    %c1_i32 = arith.constant 1 : i32
    %13 = vector.broadcast %c1_i32 : i32 to vector<1x16x1xi32>
    %14 = arith.cmpi sge, %12, %13 : vector<1x16x1xi32>
    %c1_i32_11 = arith.constant 1 : i32
    %15 = tpu.dynamic_rotate %11 by %c1_i32_11 dim 1 : vector<6x16x128xf32>, i32 -> vector<6x16x128xf32>
    %cst_12 = arith.constant 0.000000e+00 : f32
    %16 = vector.shape_cast %14 : vector<1x16x1xi1> to vector<1x16x1xi1>
    %17 = vector.broadcast %16 : vector<1x16x1xi1> to vector<6x16x128xi1>
    %18 = vector.broadcast %cst_12 : f32 to vector<6x16x128xf32>
    %19 = arith.select %17, %15, %18 : vector<6x16x128xi1>, vector<6x16x128xf32>
    %c14_i32 = arith.constant 14 : i32
    %20 = vector.broadcast %c14_i32 : i32 to vector<1x16x1xi32>
    %21 = arith.cmpi sle, %12, %20 : vector<1x16x1xi32>
    %c15_i32 = arith.constant 15 : i32
    %22 = tpu.dynamic_rotate %11 by %c15_i32 dim 1 : vector<6x16x128xf32>, i32 -> vector<6x16x128xf32>
    %cst_13 = arith.constant 0.000000e+00 : f32
    %23 = vector.shape_cast %21 : vector<1x16x1xi1> to vector<1x16x1xi1>
    %24 = vector.broadcast %23 : vector<1x16x1xi1> to vector<6x16x128xi1>
    %25 = vector.broadcast %cst_13 : f32 to vector<6x16x128xf32>
    %26 = arith.select %24, %22, %25 : vector<6x16x128xi1>, vector<6x16x128xf32>
    %c0_14 = arith.constant 0 : index
    %c0_15 = arith.constant 0 : index
    %c0_16 = arith.constant 0 : index
    %27 = vector.load %arg5[%c0_14, %c0_15, %c0_16] : memref<3x3x128xf32, #tpu.memory_space<vmem>>, vector<3x3x128xf32>
    %c0_17 = arith.constant 0 : index
    %c0_18 = arith.constant 0 : index
    %c0_19 = arith.constant 0 : index
    %28 = vector.load %arg6[%c0_17, %c0_18, %c0_19] : memref<1x1x128xf32, #tpu.memory_space<vmem>>, vector<1x1x128xf32>
    %29 = vector.shape_cast %28 : vector<1x1x128xf32> to vector<1x128xf32>
    %30 = vector.extract_strided_slice %11 {offsets = [1, 0, 0], sizes = [4, 16, 128], strides = [1, 1, 1]} : vector<6x16x128xf32> to vector<4x16x128xf32>
    %31 = vector.shape_cast %29 : vector<1x128xf32> to vector<1x1x128xf32>
    %32 = vector.broadcast %31 : vector<1x1x128xf32> to vector<4x16x128xf32>
    %33 = arith.addf %30, %32 : vector<4x16x128xf32>
    %34 = vector.extract_strided_slice %19 {offsets = [0, 0, 0], sizes = [4, 16, 128], strides = [1, 1, 1]} : vector<6x16x128xf32> to vector<4x16x128xf32>
    %35 = vector.extract_strided_slice %27 {offsets = [0, 0, 0], sizes = [1, 1, 128], strides = [1, 1, 1]} : vector<3x3x128xf32> to vector<1x1x128xf32>
    %36 = vector.shape_cast %35 : vector<1x1x128xf32> to vector<128xf32>
    %37 = vector.shape_cast %36 : vector<128xf32> to vector<1x1x128xf32>
    %38 = vector.broadcast %37 : vector<1x1x128xf32> to vector<4x16x128xf32>
    %39 = arith.mulf %34, %38 : vector<4x16x128xf32>
    %40 = arith.addf %33, %39 : vector<4x16x128xf32>
    %41 = vector.extract_strided_slice %11 {offsets = [0, 0, 0], sizes = [4, 16, 128], strides = [1, 1, 1]} : vector<6x16x128xf32> to vector<4x16x128xf32>
    %42 = vector.extract_strided_slice %27 {offsets = [0, 1, 0], sizes = [1, 1, 128], strides = [1, 1, 1]} : vector<3x3x128xf32> to vector<1x1x128xf32>
    %43 = vector.shape_cast %42 : vector<1x1x128xf32> to vector<128xf32>
    %44 = vector.shape_cast %43 : vector<128xf32> to vector<1x1x128xf32>
    %45 = vector.broadcast %44 : vector<1x1x128xf32> to vector<4x16x128xf32>
    %46 = arith.mulf %41, %45 : vector<4x16x128xf32>
    %47 = arith.addf %40, %46 : vector<4x16x128xf32>
    %48 = vector.extract_strided_slice %26 {offsets = [0, 0, 0], sizes = [4, 16, 128], strides = [1, 1, 1]} : vector<6x16x128xf32> to vector<4x16x128xf32>
    %49 = vector.extract_strided_slice %27 {offsets = [0, 2, 0], sizes = [1, 1, 128], strides = [1, 1, 1]} : vector<3x3x128xf32> to vector<1x1x128xf32>
    %50 = vector.shape_cast %49 : vector<1x1x128xf32> to vector<128xf32>
    %51 = vector.shape_cast %50 : vector<128xf32> to vector<1x1x128xf32>
    %52 = vector.broadcast %51 : vector<1x1x128xf32> to vector<4x16x128xf32>
    %53 = arith.mulf %48, %52 : vector<4x16x128xf32>
    %54 = arith.addf %47, %53 : vector<4x16x128xf32>
    %55 = vector.extract_strided_slice %19 {offsets = [1, 0, 0], sizes = [4, 16, 128], strides = [1, 1, 1]} : vector<6x16x128xf32> to vector<4x16x128xf32>
    %56 = vector.extract_strided_slice %27 {offsets = [1, 0, 0], sizes = [1, 1, 128], strides = [1, 1, 1]} : vector<3x3x128xf32> to vector<1x1x128xf32>
    %57 = vector.shape_cast %56 : vector<1x1x128xf32> to vector<128xf32>
    %58 = vector.shape_cast %57 : vector<128xf32> to vector<1x1x128xf32>
    %59 = vector.broadcast %58 : vector<1x1x128xf32> to vector<4x16x128xf32>
    %60 = arith.mulf %55, %59 : vector<4x16x128xf32>
    %61 = arith.addf %54, %60 : vector<4x16x128xf32>
    %62 = vector.extract_strided_slice %11 {offsets = [1, 0, 0], sizes = [4, 16, 128], strides = [1, 1, 1]} : vector<6x16x128xf32> to vector<4x16x128xf32>
    %63 = vector.extract_strided_slice %27 {offsets = [1, 1, 0], sizes = [1, 1, 128], strides = [1, 1, 1]} : vector<3x3x128xf32> to vector<1x1x128xf32>
    %64 = vector.shape_cast %63 : vector<1x1x128xf32> to vector<128xf32>
    %65 = vector.shape_cast %64 : vector<128xf32> to vector<1x1x128xf32>
    %66 = vector.broadcast %65 : vector<1x1x128xf32> to vector<4x16x128xf32>
    %67 = arith.mulf %62, %66 : vector<4x16x128xf32>
    %68 = arith.addf %61, %67 : vector<4x16x128xf32>
    %69 = vector.extract_strided_slice %26 {offsets = [1, 0, 0], sizes = [4, 16, 128], strides = [1, 1, 1]} : vector<6x16x128xf32> to vector<4x16x128xf32>
    %70 = vector.extract_strided_slice %27 {offsets = [1, 2, 0], sizes = [1, 1, 128], strides = [1, 1, 1]} : vector<3x3x128xf32> to vector<1x1x128xf32>
    %71 = vector.shape_cast %70 : vector<1x1x128xf32> to vector<128xf32>
    %72 = vector.shape_cast %71 : vector<128xf32> to vector<1x1x128xf32>
    %73 = vector.broadcast %72 : vector<1x1x128xf32> to vector<4x16x128xf32>
    %74 = arith.mulf %69, %73 : vector<4x16x128xf32>
    %75 = arith.addf %68, %74 : vector<4x16x128xf32>
    %76 = vector.extract_strided_slice %19 {offsets = [2, 0, 0], sizes = [4, 16, 128], strides = [1, 1, 1]} : vector<6x16x128xf32> to vector<4x16x128xf32>
    %77 = vector.extract_strided_slice %27 {offsets = [2, 0, 0], sizes = [1, 1, 128], strides = [1, 1, 1]} : vector<3x3x128xf32> to vector<1x1x128xf32>
    %78 = vector.shape_cast %77 : vector<1x1x128xf32> to vector<128xf32>
    %79 = vector.shape_cast %78 : vector<128xf32> to vector<1x1x128xf32>
    %80 = vector.broadcast %79 : vector<1x1x128xf32> to vector<4x16x128xf32>
    %81 = arith.mulf %76, %80 : vector<4x16x128xf32>
    %82 = arith.addf %75, %81 : vector<4x16x128xf32>
    %83 = vector.extract_strided_slice %11 {offsets = [2, 0, 0], sizes = [4, 16, 128], strides = [1, 1, 1]} : vector<6x16x128xf32> to vector<4x16x128xf32>
    %84 = vector.extract_strided_slice %27 {offsets = [2, 1, 0], sizes = [1, 1, 128], strides = [1, 1, 1]} : vector<3x3x128xf32> to vector<1x1x128xf32>
    %85 = vector.shape_cast %84 : vector<1x1x128xf32> to vector<128xf32>
    %86 = vector.shape_cast %85 : vector<128xf32> to vector<1x1x128xf32>
    %87 = vector.broadcast %86 : vector<1x1x128xf32> to vector<4x16x128xf32>
    %88 = arith.mulf %83, %87 : vector<4x16x128xf32>
    %89 = arith.addf %82, %88 : vector<4x16x128xf32>
    %90 = vector.extract_strided_slice %26 {offsets = [2, 0, 0], sizes = [4, 16, 128], strides = [1, 1, 1]} : vector<6x16x128xf32> to vector<4x16x128xf32>
    %91 = vector.extract_strided_slice %27 {offsets = [2, 2, 0], sizes = [1, 1, 128], strides = [1, 1, 1]} : vector<3x3x128xf32> to vector<1x1x128xf32>
    %92 = vector.shape_cast %91 : vector<1x1x128xf32> to vector<128xf32>
    %93 = vector.shape_cast %92 : vector<128xf32> to vector<1x1x128xf32>
    %94 = vector.broadcast %93 : vector<1x1x128xf32> to vector<4x16x128xf32>
    %95 = arith.mulf %90, %94 : vector<4x16x128xf32>
    %96 = arith.addf %89, %95 : vector<4x16x128xf32>
    %c0_20 = arith.constant 0 : index
    %c0_21 = arith.constant 0 : index
    %c0_22 = arith.constant 0 : index
    %c0_23 = arith.constant 0 : index
    %97 = vector.load %arg7[%c0_20, %c0_21, %c0_22, %c0_23] : memref<1x4x16x128xf32, #tpu.memory_space<vmem>>, vector<1x4x16x128xf32>
    %98 = vector.shape_cast %97 : vector<1x4x16x128xf32> to vector<4x16x128xf32>
    %99 = vector.shape_cast %96 : vector<4x16x128xf32> to vector<1x4x16x128xf32>
    tpu.vector_store %arg7[%c0_20, %c0_21, %c0_22, %c0_23], %99 {strides = array<i32>} : memref<1x4x16x128xf32, #tpu.memory_space<vmem>>, vector<1x4x16x128xf32>,
    return
  }
  func.func @transform_0(%arg0: i32, %arg1: i32) -> (i32, i32, i32, i32) {
    %c0_i32 = arith.constant 0 : i32
    %c0_i32_0 = arith.constant 0 : i32
    %c0_i32_1 = arith.constant 0 : i32
    return %arg0, %arg1, %c0_i32, %c0_i32_0 : i32, i32, i32, i32
  }
  func.func @transform_1(%arg0: i32, %arg1: i32) -> (i32, i32, i32, i32) {
    %c4_i32 = arith.constant 4 : i32
    %0 = arith.muli %arg1, %c4_i32 : i32
    %c1_i32 = arith.constant 1 : i32
    %1 = arith.subi %0, %c1_i32 : i32
    %c0_i32 = arith.constant 0 : i32
    %2 = arith.maxsi %1, %c0_i32 : i32
    %c0_i32_0 = arith.constant 0 : i32
    %c0_i32_1 = arith.constant 0 : i32
    %c0_i32_2 = arith.constant 0 : i32
    return %arg0, %2, %c0_i32_0, %c0_i32_1 : i32, i32, i32, i32
  }
  func.func @transform_2(%arg0: i32, %arg1: i32) -> (i32, i32, i32, i32) {
    %c4_i32 = arith.constant 4 : i32
    %0 = arith.muli %arg1, %c4_i32 : i32
    %c4_i32_0 = arith.constant 4 : i32
    %1 = arith.addi %0, %c4_i32_0 : i32
    %c15_i32 = arith.constant 15 : i32
    %2 = arith.minsi %1, %c15_i32 : i32
    %c0_i32 = arith.constant 0 : i32
    %c0_i32_1 = arith.constant 0 : i32
    %c0_i32_2 = arith.constant 0 : i32
    return %arg0, %2, %c0_i32, %c0_i32_1 : i32, i32, i32, i32
  }
  func.func @transform_3(%arg0: i32, %arg1: i32) -> (i32, i32, i32) {
    %c0_i32 = arith.constant 0 : i32
    %c0_i32_0 = arith.constant 0 : i32
    %c0_i32_1 = arith.constant 0 : i32
    %c0_i32_2 = arith.constant 0 : i32
    return %c0_i32, %c0_i32_0, %c0_i32_1 : i32, i32, i32
  }
  func.func @transform_4(%arg0: i32, %arg1: i32) -> (i32, i32, i32) {
    %c0_i32 = arith.constant 0 : i32
    %c0_i32_0 = arith.constant 0 : i32
    %c0_i32_1 = arith.constant 0 : i32
    %c0_i32_2 = arith.constant 0 : i32
    return %c0_i32, %c0_i32_0, %c0_i32_1 : i32, i32, i32
  }
  func.func @transform_5(%arg0: i32, %arg1: i32) -> (i32, i32, i32, i32) {
    %c0_i32 = arith.constant 0 : i32
    %c0_i32_0 = arith.constant 0 : i32
    %c0_i32_1 = arith.constant 0 : i32
    return %arg0, %arg1, %c0_i32, %c0_i32_0 : i32, i32, i32, i32
  }
}

</mosaic_0001>

<bundles_post_ra>
// kernel: tpu_custom_call.1
= control target key start
LH: loop header
LB: loop body
LE: loop exit
PB: predicated region body
PF: predicated region fallthrough
CT: control target
= control target key end

     0   :  { %s2095_s0 = inlined_call_operand.hbm [shape: f32[2,16,16,128], index: 0, kind: input, shape index: {}]   ;;  %s2096_s1 = inlined_call_operand.hbm [shape: f32[2,16,16,128], index: 1, kind: input, shape index: {}]   ;;  %s2097_s2 = inlined_call_operand.hbm [shape: f32[2,16,16,128], index: 2, kind: input, shape index: {}]   ;;  %s2098_s3 = inlined_call_operand.hbm [shape: f32[3,3,128], index: 3, kind: input, shape index: {}]   ;;  %s2099_s4 = inlined_call_operand.vmem [shape: f32[1,1,128], index: 4, kind: input, shape index: {}]   ;;  %s2100_s5 = inlined_call_operand.hbm [shape: f32[2,16,16,128], index: 5, kind: output, shape index: {}]  }
   0x1   :  { %2123 = sst [smem:[#allocation31_spill]] %s2095_s0 }
   0x2   :  { %2124 = sst [smem:[#allocation32_spill]] %s2096_s1 }
   0x3   :  { %2125 = sst [smem:[#allocation33_spill]] %s2097_s2 }
   0x4   :  { %2126 = sst [smem:[#allocation34_spill]] %s2098_s3 }
   0x5   :  { %2127 = sst [smem:[#allocation35_spill]] %s2099_s4 }
   0x6   :  { %2128 = sst [smem:[#allocation36_spill]] %s2100_s5 }
   0x7   :  { %10 = vsyncpa [#allocation3], 0 }
   0x8   :  { %12 = vsyncpa [#allocation3 + $0x1], 0 }
   0x9   :  { %13 = vsyncpa [#allocation6], 0 }
   0xa   :  { %15 = vsyncpa [#allocation6 + $0x1], 0 }
   0xb   :  { %16 = vsyncpa [#allocation9], 0 }
   0xc   :  { %17 = vsyncpa [#allocation4], 0 }
   0xd   :  { %19 = vsyncpa [#allocation4 + $0x1], 0  ;;  %s1398_s18 = smov 0   ;;  %s1400_s19 = smov 0  }
   0xe   :  { %s1402_s20 = smov 0   ;;  %s1404_s21 = smov 0  }
   0xf   :  { %s1406_s22 = smov 0   ;;  %s1408_s23 = smov 0  }
  0x10   :  { %s1410_s24 = smov 0   ;;  %s1412_s25 = smov 0  }
  0x11   :  { %s1414_s26 = smov 0   ;;  %s1416_s27 = smov 0  }
  0x12   :  { %s1418_s28 = smov 0   ;;  %s1420_s29 = smov 0  }
  0x13   :  { %s1422_s30 = smov 0   ;;  %s1424_s6 = smov 0  }
  0x14 LB: > { %2129 = sst [smem:[#allocation16_spill]] %s1303_s18  ;;  %s34_s7 = sadd.s32 1, %s1347_s29  ;;  %s1355_s6 = sphi %s1424_s6, %s25_s6   ;;  %s1351_s30 = sphi %s1422_s30, %s2194_s30   ;;  %s1347_s29 = sphi %s1420_s29, %s2193_s29   ;;  %s1343_s28 = sphi %s1418_s28, %s2199_s28   ;;  %s1339_s27 = sphi %s1416_s27, %s2191_s27   ;;  %s1335_s26 = sphi %s1414_s26, %s2190_s26   ;;  %s1331_s25 = sphi %s1412_s25, %s2198_s25   ;;  %s1327_s24 = sphi %s1410_s24, %s2197_s24   ;;  %s1323_s23 = sphi %s1408_s23, %s2188_s23   ;;  %s1319_s22 = sphi %s1406_s22, %s2196_s22   ;;  %s1315_s21 = sphi %s1404_s21, %s2195_s21   ;;  %s1311_s20 = sphi %s1402_s20, %s2215_s20   ;;  %s1307_s19 = sphi %s1400_s19, %s2186_s19   ;;  %s1303_s18 = sphi %s1398_s18, %s2185_s18  }
  0x15   : > { %2130 = sst [smem:[#allocation17_spill]] %s1307_s19  ;;  %s37_s8 = sadd.s32 1, %s1351_s30 }
  0x16   : > { %2131 = sst [smem:[#allocation18_spill]] %s1311_s20  ;;  %p35_p0 = scmp.ge.s32.totalorder %s34_s7, 4 }
  0x17   : > { %2132 = sst [smem:[#allocation19_spill]] %s1323_s23  ;;  %p2111_p1 = scmp.eq.s32.totalorder %s1355_s6, 0 }
  0x18   : > { %2133 = sst [smem:[#allocation20_spill]] %s1335_s26  ;;  %s883_s9 = sshll.u32 %s1347_s29, 2 }
  0x19   : > { %2134 = sst [smem:[#allocation21_spill]] %s1339_s27  ;;  %s82_s10 = sadd.s32 1, %s1323_s23 }
  0x1a   : > { %2135 = sst [smem:[#allocation22_spill]] %s1343_s28  ;;  %s2201_s7 = smov (%p35_p0, %s34_s7), 0 }
  0x1b   : > { %2136 = sst [smem:[#allocation23_spill]] %s1347_s29  ;;  %s2203_s8 = smov (!%p35_p0, %s37_s8), %s1351_s30 }
  0x1c   : > { %2137 = sst [smem:[#allocation24_spill]] %s1351_s30  ;;  %s42_s11 = ssub.s32 %s1347_s29, %s2201_s7 }
  0x1d   : > { %2138 = sst [smem:[#allocation25_spill]] %s2201_s7  ;;  %s884_s12 = sadd.s32 4294967295, %s883_s9 }
  0x1e   : > { %p39_p2 = scmp.ge.s32.totalorder %s2203_s8, 2  ;;  %p71_p3 = scmp.gt.s32.totalorder %s884_s12, 0 }
  0x1f   : > { %s885_s13 = sshll.u32 %s2201_s7, 2  ;;  %p89_p4 = scmp.ne.s32.totalorder %s1323_s23, %s1319_s22 }
  0x20   : > { %s2205_s8 = smov (%p39_p2, %s2203_s8), 0  ;;  %s2207_s12 = smov (!%p71_p3, %s884_s12), 0 }
  0x21   : > { %2139 = sst [smem:[#allocation26_spill]] %s2205_s8  ;;  %s1485_s14 = ssub.s32 %s1351_s30, %s2205_s8 }
  0x22   : > { %2140 = sst [smem:[#allocation27_spill]] %s1485_s14  ;;  %s886_s15 = sadd.s32 4294967295, %s885_s13 }
  0x23   : > { %s1488_s16 = sor.u32 %s42_s11, %s1485_s14  ;;  %p75_p5 = scmp.gt.s32.totalorder %s886_s15, 0 }
  0x24   : > { %p1493_p7 = por %p89_p4, %p2111_p1  ;;  %p95_p8 = scmp.ne.s32.totalorder %s1319_s22, %s1315_s21 }
  0x25   : > { %s2209_s15 = smov (!%p75_p5, %s886_s15), 0  ;;  %s1499_s8 = sadd.s32 4, %s883_s9 }
  0x26   : > { %2142 = sst [smem:[#allocation28_spill]] %s1499_s8  ;;  %s78_s7 = ssub.s32 %s2207_s12, %s2209_s15 }
  0x27   : > { %s79_s5 = sor.u32 %s78_s7, %s1485_s14  ;;  %s1503_s11 = sadd.s32 4, %s885_s13 }
  0x28   : > { %p80_p10 = scmp.eq.s32.totalorder %s79_s5, 0  ;;  %p2110_p12 = scmp.lt.s32.totalorder %s1355_s6, 8 }
  0x29   : > { %s1511_s4 = sshll.u32 %s1351_s30, 5  ;;  %s265_s27 = sand.u32 1, %s1355_s6  }
  0x2a   : > { %s1508_s28 = scalar_select %p80_p10, %s1323_s23, %s82_s10  }
  0x2b   : > { %s267_s9 = sand.u32 1, %s1323_s23   ;;  %s900_s18 = sshll.u32 %s2207_s12, 1 }
  0x2c   : > { %2143 = sst [smem:[#allocation29_spill]] %s1508_s28  ;;  %s897_s2 = sshll.u32 %s267_s9, 4 }
  0x2d   : > { %s279_s15 = sadd.s32 %s900_s18, %s1511_s4  ;;  %s269_s7 = scalar_lea.vmem [#allocation5], %s897_s2 }
  0x2e   : > { %s902_s19 = sshll.u32 %s279_s15, 7  ;;  %s282_s13 = sshll.u32 %s269_s7, 4  ;;  %s283_s13 = int_to_ptr.vmem [resolvable:$true] %s282_s13 }
  0x2f   : > { %s2144_s1 = sld [smem:[#allocation32_spill]]  ;;  %p1523_p13 = pnand %p2110_p12, %p1493_p7 }
  0x30   : > { %s1527_s10 = scalar_lea.sflag [#allocation6], %s265_s27  ;;  %s1102_s18 = scalar_lea.vmem %s283_s13, 256 }
  0x31   : > { %p1091_p0 = pneg %p1523_p13  ;;  %p1103_p2 = scmp.ne.s32.totalorder %s283_s13, %s1102_s18 }
  0x32   : > { %s1357_s2 = smov [#allocation5]  }
  0x33   : > { %p1105_p3 = pnand %p1103_p2, %p1091_p0  ;;  %s1107_s12 = sshll.u32 %s1357_s2, 4  ;;  %s1108_s12 = int_to_ptr.vmem [resolvable:$false] %s1107_s12 }
  0x34   : > { %p1110_p5 = scmp.lt.s32.totalorder %s283_s13, %s1108_s12 }
  0x35   : > { %s281_s20 = scalar_lea.hbm %s2144_s1, %s902_s19  ;;  %p1106_p4 = pneg %p1105_p3 }
  0x36   : > { %s1109_s19 = scalar_lea.vmem %s1108_s12, 512 }
  0x37   : > { %p1111_p10 = scmp.lt.s32.totalorder %s1109_s19, %s1102_s18 }
  0x39   : > { %p1112_p11 = por %p1111_p10, %p1110_p5 }
  0x3b   : > { %p1113_p7 = pnand %p1112_p11, %p1106_p4 }
  0x3d   : > { %1116 = shalt.err (!%p1113_p7)
}
  0x3e   : > { %s2112_s8 = smov 128   ;;  %s2114_s27 = smov 8  }
  0x3f   : > { %946 = dma.hbm_to_vmem [thread:$0]  (!%p1523_p13), %s281_s20, 256, %s283_s13, %s1527_s10, %s2112_s8, %s2112_s8, %s2114_s27  }
  0x40   : > { %s1538_s14 = sadd.s32 4294967295, %s1355_s6   ;;  %p889_p11 = scmp.ge.s32.totalorder %s1355_s6, 1 }
  0x41   : > { %p2117_p0 = scmp.eq.s32.totalorder %s1538_s14, 0  ;;  %p212_p3 = scmp.lt.s32.totalorder %s1355_s6, 9 }
  0x42   : > { %s1360_s20 = smov [#allocation8]  }
  0x43   : > { %p1549_p4 = por %p95_p8, %p2117_p0  ;;  %p1553_p5 = pnand %p889_p11, %p212_p3 }
  0x44   : > { %s224_s15 = sshll.u32 %s1360_s20, 4  ;;  %s225_s15 = int_to_ptr.vmem [resolvable:$true] %s224_s15 }
  0x45   : > { %p936_p13 = pneg %p1553_p5  ;;  %s1128_s7 = scalar_lea.vmem %s225_s15, 192 }
  0x46   : > { %p1129_p9 = scmp.ne.s32.totalorder %s225_s15, %s1128_s7  ;;  %p1136_p2 = scmp.lt.s32.totalorder %s225_s15, %s225_s15 }
  0x47   : > { %p937_p10 = pnand %p936_p13, %p2117_p0  ;;  %p1137_p1 = scmp.lt.s32.totalorder %s1128_s7, %s1128_s7 }
  0x49   : > { %p1119_p7 = pneg %p937_p10  ;;  %p1138_p6 = por %p1137_p1, %p1136_p2 }
  0x4b   : > { %p1131_p12 = pnand %p1129_p9, %p1119_p7 }
  0x4d   : > { %p1132_p8 = pneg %p1131_p12 }
  0x4f   : > { %p1139_p11 = pnand %p1138_p6, %p1132_p8 }
  0x51   : > { %1142 = shalt.err (!%p1139_p11)
}
  0x52   : > { %s1361_s21 = smov 64   ;;  %s1362_s13 = smov 4  }
  0x53   : > { %s2148_s3 = sld [smem:[#allocation34_spill]]  ;;  %s882_s2 = sadd.s32 4294967294, %s1355_s6  }
  0x54   : > { %s46_s12 = sadd.s32 1, %s1335_s26  ;;  %p2149_p1 = scmp.eq.s32.totalorder %s1488_s16, 0 }
  0x55   : > { %p53_p6 = scmp.ne.s32.totalorder %s1335_s26, %s1331_s25  ;;  %p59_p9 = scmp.ne.s32.totalorder %s1331_s25, %s1327_s24 }
  0x56   : > { %s1569_s19 = scalar_select %p2149_p1, %s1335_s26, %s46_s12  }
  0x57   : > { %p205_p12 = scmp.eq.s32.totalorder %s882_s2, 7  ;;  %s241_s20 = sand.u32 1, %s1335_s26  }
  0x58   : > { %2150 = sst [smem:[#allocation30_spill]] %s1569_s19  ;;  %p2151_p2 = scmp.eq.s32.totalorder %s1355_s6, 0 }
  0x59   : > { %939 = dma.hbm_to_vmem [thread:$0]  (!%p937_p10), %s2148_s3, 192, %s225_s15, [#allocation9], %s1361_s21, %s1361_s21, %s1362_s13  }
  0x5a   : > { %p55_p3 = por %p2151_p2, %p53_p6  ;;  %p1580_p13 = por %p2117_p0, %p59_p9 }
  0x5b   : > { %p2153_p7 = scmp.eq.s32.totalorder %s1538_s14, 7  ;;  %p1590_p10 = por %p205_p12, %p59_p9 }
  0x5c   : > { %s892_s21 = sshll.u32 %s241_s20, 6  ;;  %s922_s13 = sshll.u32 %s1347_s29, 3 }
  0x5d   : > { %p1586_p8 = por %p2153_p7, %p53_p6  ;;  %s252_s5 = sadd.s32 %s922_s13, %s1511_s4 }
  0x5e   : > { %s2155_s16 = scalar_select %p1590_p10, 1, 0 }
  0x5f   : > { %s2154_s15 = scalar_select %p1586_p8, 1, 0 }
  0x60   : > { %s245_s18 = scalar_lea.vmem [#allocation2], %s892_s21  ;;  %s896_s12 = sshll.u32 %s252_s5, 7 }
  0x61   : > { %s255_s2 = sshll.u32 %s245_s18, 4  ;;  %s2156_s0 = sld [smem:[#allocation31_spill]]  ;;  %s256_s2 = int_to_ptr.vmem [resolvable:$true] %s255_s2 }
  0x62   : > { %p2157_p11 = scmp.lt.s32.totalorder %s1355_s6, 8  ;;  %s242_s30 = scalar_lea.sflag [#allocation3], %s241_s20 }
  0x63   : > { %s1156_s19 = scalar_lea.vmem %s256_s2, 1024  ;;  %s1363_s21 = smov [#allocation2]  }
  0x64   : > { %p1601_p1 = pnand %p2157_p11, %p55_p3  ;;  %p1157_p9 = scmp.ne.s32.totalorder %s256_s2, %s1156_s19 }
  0x65   : > { %s1161_s13 = sshll.u32 %s1363_s21, 4  ;;  %s1162_s13 = int_to_ptr.vmem [resolvable:$false] %s1161_s13 }
  0x66   : > { %p1145_p6 = pneg %p1601_p1  ;;  %s1163_s5 = scalar_lea.vmem %s1162_s13, 2048 }
  0x67   : > { %s254_s1 = scalar_lea.hbm %s2156_s0, %s896_s12  ;;  %p1164_p7 = scmp.lt.s32.totalorder %s256_s2, %s1162_s13 }
  0x68   : > { %p1159_p12 = pnand %p1157_p9, %p1145_p6  ;;  %p1165_p0 = scmp.lt.s32.totalorder %s1163_s5, %s1156_s19 }
  0x6a   : > { %p1160_p2 = pneg %p1159_p12  ;;  %p1166_p10 = por %p1165_p0, %p1164_p7 }
  0x6c   : > { %p1167_p8 = pnand %p1166_p10, %p1160_p2 }
  0x6e   : > { %1170 = shalt.err (!%p1167_p8)
}
  0x6f   : > { %s2159_s8 = smov 8   ;;  %s2160_s27 = smov 128  }
  0x70   : > { %s2161_s20 = sld [smem:[#allocation18_spill]]  ;;  %p2167_p3 = scmp.lt.s32.totalorder %s1503_s11, 15 }
  0x71   : > { %s2162_s18 = sld [smem:[#allocation28_spill]]  ;;  %p2168_p11 = scmp.eq.s32.totalorder %s1355_s6, 0 }
  0x72   : > { %s2163_s12 = sld [smem:[#allocation17_spill]]  ;;  %s2213_s11 = smov (!%p2167_p3, %s1503_s11), 15 }
  0x73   : > { %s2164_s21 = sld [smem:[#allocation16_spill]]  ;;  %p2169_p12 = scmp.eq.s32.totalorder %s1538_s14, 0 }
  0x74   : > { %s2165_s13 = sld [smem:[#allocation27_spill]] }
  0x75   : > { %943 = dma.hbm_to_vmem [thread:$0]  (!%p1601_p1), %s254_s1, 1024, %s256_s2, %s242_s30, %s2160_s27, %s2160_s27, %s2159_s8  }
  0x76   : > { %s118_s3 = sadd.s32 1, %s2161_s20  ;;  %s294_s5 = sand.u32 1, %s2161_s20  }
  0x77   : > { %p2166_p0 = scmp.lt.s32.totalorder %s2162_s18, 15  ;;  %s903_s1 = sshll.u32 %s294_s5, 4 }
  0x78   : > { %p125_p8 = scmp.ne.s32.totalorder %s2161_s20, %s2163_s12  ;;  %s296_s28 = scalar_lea.vmem [#allocation7], %s903_s1 }
  0x79   : > { %s2211_s18 = smov (!%p2166_p0, %s2162_s18), 15  ;;  %p131_p10 = scmp.ne.s32.totalorder %s2163_s12, %s2164_s21 }
  0x7a   : > { %s114_s19 = ssub.s32 %s2211_s18, %s2213_s11  ;;  %p127_p6 = por %p125_p8, %p2168_p11 }
  0x7b   : > { %s115_s0 = sor.u32 %s114_s19, %s2165_s13  ;;  %p1629_p2 = por %p131_p10, %p2169_p12 }
  0x7c   : > { %p116_p9 = scmp.eq.s32.totalorder %s115_s0, 0  ;;  %s905_s30 = sshll.u32 %s2211_s18, 1 }
  0x7d   : > { %s2170_s29 = scalar_select %p1629_p2, 1, 0 }
  0x7e   : > { %s2215_s20 = smov (!%p116_p9, %s2161_s20), %s118_s3  ;;  %s306_s2 = sadd.s32 %s905_s30, %s1511_s4 }
  0x7f   : > { %s907_s26 = sshll.u32 %s306_s2, 7  ;;  %s309_s12 = sshll.u32 %s296_s28, 4  ;;  %s310_s12 = int_to_ptr.vmem [resolvable:$true] %s309_s12 }
  0x80   : > { %s2171_s23 = sld [smem:[#allocation33_spill]]  ;;  %p2172_p1 = scmp.lt.s32.totalorder %s1355_s6, 8 }
  0x81   : > { %s1184_s18 = scalar_lea.vmem %s310_s12, 256  ;;  %s1364_s4 = smov [#allocation7]  }
  0x82   : > { %p1642_p7 = pnand %p2172_p1, %p127_p6  ;;  %p1185_p3 = scmp.ne.s32.totalorder %s310_s12, %s1184_s18 }
  0x83   : > { %s1189_s3 = sshll.u32 %s1364_s4, 4  ;;  %s1190_s3 = int_to_ptr.vmem [resolvable:$false] %s1189_s3 }
  0x84   : > { %p1173_p0 = pneg %p1642_p7  ;;  %s1191_s28 = scalar_lea.vmem %s1190_s3, 512 }
  0x85   : > { %p1192_p11 = scmp.lt.s32.totalorder %s310_s12, %s1190_s3  ;;  %p1193_p9 = scmp.lt.s32.totalorder %s1191_s28, %s1184_s18 }
  0x86   : > { %s308_s13 = scalar_lea.hbm %s2171_s23, %s907_s26  ;;  %p1187_p8 = pnand %p1185_p3, %p1173_p0 }
  0x87   : > { %p1194_p12 = por %p1193_p9, %p1192_p11 }
  0x88   : > { %p1188_p10 = pneg %p1187_p8 }
  0x8a   : > { %p1195_p2 = pnand %p1194_p12, %p1188_p10 }
  0x8c   : > { %1198 = shalt.err (!%p1195_p2)
}
  0x8d   : > { %949 = dma.hbm_to_vmem [thread:$0]  (!%p1642_p7), %s308_s13, 256, %s310_s12, %s1527_s10, %s2160_s27, %s2160_s27, %s2159_s8  }
  0x8e   : > { %321 = sbr.rel (%p1553_p5) target bundleno = 246 (0xf6), region = 40  ;;  %s1657_s23 = sand.u32 (!%p1553_p5), 1, %s1331_s25  }
  0x8f   : > { %s909_s26 = sshll.u32 (!%p1553_p5), %s1657_s23, 6  ;;  %s324_s19 = scalar_lea.sflag (!%p1553_p5), [#allocation3], %s1657_s23 }
  0x90   : > { %s1663_s5 = scalar_lea.vmem (!%p1553_p5), [#allocation2], %s909_s26 }
  0x93   : > { %1282 = dma.done.wait (%p1580_p13), %s324_s19, 1024  }
  0x94   : > { %1284 = vsyncadd (%p1580_p13), %s324_s19, 4294966272  ;;  %s332_s10 = sand.u32 1, %s1538_s14   ;;  %s334_s9 = sand.u32 1, %s1319_s22  }
  0x95   : > { %s1671_s8 = sshll.u32 %s334_s9, 4  ;;  %s333_s27 = scalar_lea.sflag [#allocation6], %s332_s10 }
  0x96   : > { %s336_s1 = scalar_lea.vmem [#allocation5], %s1671_s8 }
  0x97   : > { %1286 = dma.done.wait (%p1549_p4), %s333_s27, 256  }
  0x98   : > { %1288 = vsyncadd (%p1549_p4), %s333_s27, 4294967040  ;;  %s2174_s30 = sld [smem:[#allocation17_spill]]  ;;  %p2175_p5 = scmp.ne.s32.totalorder %s2170_s29, 0 }
  0x9e   : > { %s343_s2 = sand.u32 1, %s2174_s30  }
  0x9f   : > { %s1679_s7 = sshll.u32 %s343_s2, 4 }
  0xa0   : > { %s345_s12 = scalar_lea.vmem [#allocation7], %s1679_s7 }
  0xa1   : > { %1290 = dma.done.wait (%p2175_p5), %s333_s27, 256  }
  0xa2   : > { %1292 = vsyncadd (%p2175_p5), %s333_s27, 4294967040  ;;  %p2176_p13 = scmp.eq.s32.totalorder %s1538_s14, 0 }
  0xa4   : > { %1294 = dma.done.wait (%p2176_p13), [#allocation9], 192   ;;  %p2177_p6 = pmov %p2176_p13 }
  0xa5   : > { %s2178_s17 = sld [smem:[#allocation21_spill]]  ;;  %v420_v0 = vlaneseq  ;;  %v1698_v3 = vld [vmem:[%s1663_s5] sm:$0xff]  ;;  %v1701_v4 = vld [vmem:[%s1663_s5 + $0x8] sm:$0xff]  ;;  %v1704_v5 = vld [vmem:[%s1663_s5 + $0x10] sm:$0xff]  ;;  %s1891_s13 = scalar_lea.vmem [#allocation10], %s909_s26 }
  0xa6   : > { %1296 = vsyncadd (%p2177_p6), [#allocation9], 4294967104  ;;  %v1708_v7 = vld [vmem:[%s1663_s5 + $0x18] sm:$0xff]  ;;  %v426_v9 = vrot.slane %v1698_v3, 7  ;;  %v427_v10 = vrot.slane %v1704_v5, 7  ;;  %v432_v11 = vrot.slane %v1701_v4, 7 }
  0xa7   : > { %v1691_v1 = vshrl.u32 %v420_v0, 7  ;;  %v433_v15 = vrot.slane %v1708_v7, 7  ;;  %v469_v17 = vrot.slane %v1698_v3, 1  ;;  %v470_v20 = vrot.slane %v1704_v5, 1  ;;  %v509_v22 = vld [vmem:[#allocation8] sm:$0x7] }
  0xa8   : > { %v475_v24 = vrot.slane %v1701_v4, 1  ;;  %v476_v25 = vrot.slane %v1708_v7, 1  ;;  %v510_v30 = vld [vmem:[#allocation8 + $0x4] sm:$0x7]  ;;  %s2179_s11 = sld [smem:[#allocation35_spill]]  ;;  %s732_s26 = sshll.u32 %s1891_s13, 4  ;;  %s2011_s26 = int_to_ptr.vmem [resolvable:$true] %s732_s26 }
  0xa9   : > { %vm423_vm0 = vcmp.ge.s32.totalorder %v1691_v1, 1  ;;  %vm437_vm1 = vcmp.lt.s32.totalorder %v1691_v1, 1  ;;  %vm480_vm2 = vcmp.lt.s32.totalorder %v1691_v1, 7  ;;  %v529_v2 = vsub.s32 0, %v1691_v1  ;;  %v1753_v33 = vld [vmem:[%s1663_s5 + $0x20] sm:$0xff]  ;;  %s2180_s18 = sld [smem:[#allocation22_spill]] }
  0xaa   : > { %v549_v6 = vsub.s32 1, %v1691_v1  ;;  %v569_v12 = vsub.s32 2, %v1691_v1  ;;  %v445_v19 = vsel %vm437_vm1, %v432_v11, %v426_v9  ;;  %v446_v23 = vsel %vm437_vm1, %v433_v15, %v427_v10  ;;  %v511_v37 = vld [vmem:[#allocation8 + $0x8] sm:$0x7]  ;;  %s2181_s9 = sld [smem:[#allocation36_spill]]  ;;  %s716_s27 = scalar_lea.sflag [#allocation4], %s1657_s23 }
  0xab   : > { %p404_p4 = scmp.gt.s32.totalorder %s2178_s17, 0  ;;  %v1736_v26 = vadd.s32 8, %v1691_v1  ;;  %p412_p2 = scmp.lt.s32.totalorder %s2178_s17, 3  ;;  %v456_v28 = vsel %vm423_vm0, %v445_v19, 0.0  ;;  %v458_v29 = vsel %vm423_vm0, %v446_v23, 0.0  ;;  %v1750_v32 = vrot.slane %v509_v22, %v529_v2 }
  0xac   : > { %v482_v36 = vsel %vm480_vm2, %v469_v17, %v475_v24  ;;  %v483_v39 = vsel %vm480_vm2, %v470_v20, %v476_v25  ;;  %v1769_v43 = vrot.slane %v509_v22, %v549_v6  ;;  %v1771_v44 = vrot.slane %v509_v22, %v569_v12  ;;  %s923_s4 = sshll.u32 %s2178_s17, 3  ;;  %p2182_p7 = scmp.ne.s32.totalorder %s2154_s15, 0 }
  0xad   : > { %s1078_s21 = scalar_select %p404_p4, 255, 0  ;;  %v535_v42 = vmul.f32 %v1750_v32, %v458_v29  ;;  %v1773_v45 = vrot.slane %v510_v30, %v529_v2  ;;  %v1775_v46 = vrot.slane %v510_v30, %v549_v6  ;;  %v1777_v49 = vrot.slane %v510_v30, %v569_v12 }
  0xae   : > { %v1748_v31 = vld [vmem:[%s2179_s11] ss:$0 sm:$0xff]  ;;  %v1779_v50 = vrot.slane %v511_v37, %v529_v2  ;;  %v555_v52 = vmul.f32 %v1769_v43, %v1704_v5  ;;  %v1787_v54 = vmul.f32 %v1750_v32, %v456_v28  ;;  %v1790_v55 = vmul.f32 %v1771_v44, %v482_v36  ;;  %s1084_s0 = scalar_select %p412_p2, 255, 0 }
  0xaf   : > { %v1710_v8 = vld [vmem:[%s336_s1] sm:%s1078_s21]  ;;  %v1716_v13 = vld [vmem:[%s336_s1 + $0x8] sm:%s1078_s21]  ;;  %v519_v38 = vadd.f32 %v1748_v31, %v1698_v3  ;;  %v523_v40 = vadd.f32 %v1748_v31, %v1753_v33  ;;  %v575_v56 = vmul.f32 %v1771_v44, %v483_v39  ;;  %v591_v57 = vmul.f32 %v1773_v45, %v456_v28  ;;  %s918_s3 = sshll.u32 %s2180_s18, 5  ;;  %s1199_s1 = scalar_lea.vmem %s2011_s26, 1024 }
  0xb0   : > { %v425_v14 = vrot.slane %v1710_v8, 7  ;;  %v468_v16 = vrot.slane %v1710_v8, 1  ;;  %v431_v18 = vrot.slane %v1716_v13, 7  ;;  %v474_v21 = vrot.slane %v1716_v13, 1  ;;  %s729_s28 = sadd.s32 %s923_s4, %s918_s3  ;;  %p1200_p1 = scmp.ne.s32.totalorder %s2011_s26, %s1199_s1 }
  0xb1   : > { %v543_v48 = vadd.f32 %v535_v42, %v523_v40  ;;  %v551_v51 = vmul.f32 %v1710_v8, %v1769_v43  ;;  %v1795_v60 = vmul.f32 %v1773_v45, %v458_v29  ;;  %v611_v61 = vmul.f32 %v1775_v46, %v1698_v3  ;;  %s919_s19 = sshll.u32 %s729_s28, 7  ;;  %s1365_s30 = smov [#allocation10]  }
  0xb2   : > { %v444_v27 = vsel %vm437_vm1, %v431_v18, %v425_v14  ;;  %v481_v35 = vsel %vm480_vm2, %v468_v16, %v474_v21  ;;  %v631_v62 = vmul.f32 %v1777_v49, %v482_v36  ;;  %v1801_v63 = vmul.f32 %v1777_v49, %v483_v39  ;;  %s2017_s8 = scalar_lea.hbm %s2181_s9, %s919_s19  ;;  %p1201_p0 = pnand %p1200_p1, %p2182_p7 }
  0xb3   : > { %v454_v34 = vsel %vm423_vm0, %v444_v27, 0.0  ;;  %v571_v53 = vmul.f32 %v1771_v44, %v481_v35  ;;  %v563_v59 = vadd.f32 %v555_v52, %v543_v48  ;;  %v651_v0 = vmul.f32 %v1779_v50, %v458_v29  ;;  %s1203_s2 = sshll.u32 %s1365_s30, 4  ;;  %s1204_s2 = int_to_ptr.vmem [resolvable:$false] %s1203_s2 }
  0xb4   : > { %v531_v41 = vmul.f32 %v1750_v32, %v454_v34  ;;  %v1804_v2 = vrot.slane %v511_v37, %v549_v6  ;;  %v1808_v22 = vrot.slane %v511_v37, %v569_v12  ;;  %v438_v23 = vsel %vm437_vm1, %v425_v14, %v431_v18  ;;  %v1826_v14 = vld [vmem:[%s1663_s5 + $0x28] sm:$0xff]  ;;  %p1202_p3 = pneg %p1201_p0  ;;  %s1205_s7 = scalar_lea.vmem %s1204_s2, 2048 }
  0xb5   : > { %v1806_v19 = vadd.f32 %v575_v56, %v563_v59  ;;  %v439_v27 = vsel %vm437_vm1, %v426_v9, %v432_v11  ;;  %v440_v28 = vsel %vm437_vm1, %v427_v10, %v433_v15  ;;  %vm467_vm3 = vcmp.le.s32.totalorder %v1736_v26, 14  ;;  %p1206_p8 = scmp.lt.s32.totalorder %s2011_s26, %s1204_s2  ;;  %p1207_p10 = scmp.lt.s32.totalorder %s1205_s7, %s1199_s1 }
  0xb6   : > { %v539_v47 = vadd.f32 %v531_v41, %v519_v38  ;;  %v487_v6 = vsel %vm480_vm2, %v474_v21, %v468_v16  ;;  %v671_v29 = vmul.f32 %v1804_v2, %v1704_v5  ;;  %v488_v18 = vsel %vm480_vm2, %v475_v24, %v469_v17 }
  0xb7   : > { %v489_v9 = vsel %vm480_vm2, %v476_v25, %v470_v20  ;;  %v498_v10 = vsel %vm467_vm3, %v487_v6, 0.0  ;;  %v500_v11 = vsel %vm467_vm3, %v488_v18, 0.0  ;;  %v520_v15 = vadd.f32 %v1748_v31, %v1701_v4  ;;  %p1208_p11 = por %p1207_p10, %p1206_p8 }
  0xb8   : > { %v559_v58 = vadd.f32 %v551_v51, %v539_v47  ;;  %v524_v16 = vadd.f32 %v1748_v31, %v1826_v14  ;;  %v502_v30 = vsel %vm467_vm3, %v489_v9, 0.0  ;;  %v532_v17 = vmul.f32 %v1750_v32, %v438_v23 }
  0xb9   : > { %v536_v20 = vmul.f32 %v1750_v32, %v440_v28  ;;  %v691_v24 = vmul.f32 %v1808_v22, %v483_v39  ;;  %v534_v25 = vmul.f32 %v1750_v32, %v439_v27  ;;  %v552_v34 = vmul.f32 %v1716_v13, %v1769_v43  ;;  %p1209_p9 = pnand %p1208_p11, %p1202_p3 }
  0xba   : > { %v579_v8 = vadd.f32 %v571_v53, %v559_v58  ;;  %v556_v35 = vmul.f32 %v1769_v43, %v1708_v7  ;;  %v540_v37 = vadd.f32 %v532_v17, %v520_v15  ;;  %v572_v40 = vmul.f32 %v1771_v44, %v498_v10  ;;  %v1863_v53 = vld [vmem:[%s1663_s5 + $0x30] sm:$0xff] }
  0xbb   : > { %v544_v38 = vadd.f32 %v536_v20, %v524_v16  ;;  %v1852_v41 = vmul.f32 %v1771_v44, %v500_v11  ;;  %v576_v42 = vmul.f32 %v1771_v44, %v502_v30  ;;  %v592_v39 = vmul.f32 %v1773_v45, %v439_v27 }
  0xbc   : > { %v599_v12 = vadd.f32 %v591_v57, %v579_v8  ;;  %v1857_v47 = vmul.f32 %v1773_v45, %v440_v28  ;;  %v560_v13 = vadd.f32 %v552_v34, %v540_v37  ;;  %v612_v51 = vmul.f32 %v1775_v46, %v1701_v4 }
  0xbd   : > { %v632_v52 = vmul.f32 %v1777_v49, %v500_v11  ;;  %v564_v56 = vadd.f32 %v556_v35, %v544_v38  ;;  %v1866_v57 = vmul.f32 %v1777_v49, %v502_v30  ;;  %v652_v58 = vmul.f32 %v1779_v50, %v440_v28  ;;  %v1904_v35 = vld [vmem:[%s1663_s5 + $0x38] sm:$0xff] }
  0xbe   : > { %v619_v21 = vadd.f32 %v611_v61, %v599_v12  ;;  %v428_v59 = vrot.slane %v1753_v33, 7  ;;  %v434_v8 = vrot.slane %v1826_v14, 7  ;;  %v471_v23 = vrot.slane %v1753_v33, 1 }
  0xbf   : > { %v477_v27 = vrot.slane %v1826_v14, 1  ;;  %v521_v6 = vadd.f32 %v1748_v31, %v1704_v5  ;;  %v525_v28 = vadd.f32 %v1748_v31, %v1863_v53  ;;  %v553_v9 = vmul.f32 %v1769_v43, %v1698_v3 }
  0xc0   : > { %v639_v36 = vadd.f32 %v631_v62, %v619_v21  ;;  %v580_v62 = vadd.f32 %v572_v40, %v560_v13  ;;  %v692_v10 = vmul.f32 %v1808_v22, %v502_v30  ;;  %v1894_v21 = vadd.f32 %v576_v42, %v564_v56 }
  0xc1   : > { %v484_v15 = vsel %vm480_vm2, %v471_v23, %v477_v27  ;;  %v541_v16 = vadd.f32 %v1787_v54, %v521_v6  ;;  %v557_v30 = vmul.f32 %v1769_v43, %v1753_v33  ;;  %v613_v54 = vmul.f32 %v1775_v46, %v1704_v5 }
  0xc2   : > { %v659_v48 = vadd.f32 %v651_v0, %v639_v36  ;;  %v672_v0 = vmul.f32 %v1804_v2, %v1708_v7  ;;  %v600_v18 = vadd.f32 %v592_v39, %v580_v62  ;;  %v635_v38 = vmul.f32 %v1777_v49, %v484_v15 }
  0xc3   : > { %v561_v20 = vadd.f32 %v553_v9, %v541_v16  ;;  %v441_v39 = vsel %vm437_vm1, %v428_v59, %v434_v8  ;;  %v522_v13 = vadd.f32 %v1748_v31, %v1708_v7  ;;  %v526_v56 = vadd.f32 %v1748_v31, %v1904_v35 }
  0xc4   : > { %v679_v61 = vadd.f32 %v671_v29, %v659_v48  ;;  %v447_v29 = vsel %vm437_vm1, %v434_v8, %v428_v59  ;;  %v620_v17 = vadd.f32 %v612_v51, %v600_v18  ;;  %v490_v48 = vsel %vm480_vm2, %v477_v27, %v471_v23 }
  0xc5   : > { %v460_v11 = vsel %vm423_vm0, %v447_v29, 0.0  ;;  %v581_v42 = vadd.f32 %v1790_v55, %v561_v20  ;;  %v538_v55 = vmul.f32 %v1750_v32, %v441_v39  ;;  %v542_v62 = vadd.f32 %v534_v25, %v522_v13 }
  0xc6   : > { %v699_v12 = vadd.f32 %v691_v24, %v679_v61  ;;  %v537_v3 = vmul.f32 %v1750_v32, %v460_v11  ;;  %v577_v24 = vmul.f32 %v1771_v44, %v484_v15  ;;  %v595_v34 = vmul.f32 %v1773_v45, %v460_v11 }
  0xc7   : > { %v640_v36 = vadd.f32 %v632_v52, %v620_v17  ;;  %v653_v40 = vmul.f32 %v1779_v50, %v460_v11  ;;  %v504_v52 = vsel %vm467_vm3, %v490_v48, 0.0  ;;  %v601_v61 = vadd.f32 %v1795_v60, %v581_v42 }
  0xc8   : > { %707 = vst [vmem:[%s1891_s13] sm:$0xff] %v699_v12  ;;  %v545_v37 = vadd.f32 %v537_v3, %v525_v28  ;;  %v554_v59 = vmul.f32 %v1769_v43, %v1701_v4  ;;  %v693_v23 = vmul.f32 %v1808_v22, %v484_v15  ;;  %v558_v27 = vmul.f32 %v1769_v43, %v1826_v14 }
  0xc9   : > { %v660_v5 = vadd.f32 %v652_v58, %v640_v36  ;;  %v673_v58 = vmul.f32 %v1804_v2, %v1753_v33  ;;  %v621_v31 = vadd.f32 %v613_v54, %v601_v61  ;;  %v546_v28 = vadd.f32 %v538_v55, %v526_v56 }
  0xca   : > { %v565_v51 = vadd.f32 %v557_v30, %v545_v37  ;;  %v562_v60 = vadd.f32 %v554_v59, %v542_v62  ;;  %v578_v32 = vmul.f32 %v1771_v44, %v504_v52  ;;  %v596_v25 = vmul.f32 %v1773_v45, %v441_v39  ;;  %v1088_v62 = vld [vmem:[%s345_s12 + $0x8] sm:%s1084_s0] }
  0xcb   : > { %v680_v8 = vadd.f32 %v672_v0, %v660_v5  ;;  %v614_v4 = vmul.f32 %v1775_v46, %v1708_v7  ;;  %v641_v0 = vadd.f32 %v1801_v63, %v621_v31  ;;  %v636_v29 = vmul.f32 %v1777_v49, %v504_v52 }
  0xcc   : > { %v585_v6 = vadd.f32 %v577_v24, %v565_v51  ;;  %v582_v18 = vadd.f32 %v1852_v41, %v562_v60  ;;  %v654_v43 = vmul.f32 %v1779_v50, %v441_v39  ;;  %v566_v9 = vadd.f32 %v558_v27, %v546_v28 }
  0xcd   : > { %v700_v12 = vadd.f32 %v692_v10, %v680_v8  ;;  %v429_v10 = vrot.slane %v1863_v53, 7  ;;  %v435_v44 = vrot.slane %v1904_v35, 7  ;;  %v472_v11 = vrot.slane %v1863_v53, 1 }
  0xce   : > { %v661_v15 = vadd.f32 %v653_v40, %v641_v0  ;;  %v602_v7 = vadd.f32 %v1857_v47, %v582_v18  ;;  %v674_v63 = vmul.f32 %v1804_v2, %v1826_v14  ;;  %v478_v41 = vrot.slane %v1904_v35, 1 }
  0xcf   : > { %708 = vst [vmem:[%s1891_s13 + $0x8] sm:$0xff] %v700_v12  ;;  %v694_v16 = vmul.f32 %v1808_v22, %v504_v52  ;;  %v448_v17 = vsel %vm437_vm1, %v435_v44, %v429_v10  ;;  %v603_v3 = vadd.f32 %v595_v34, %v1806_v19  ;;  %v615_v30 = vmul.f32 %v1775_v46, %v1753_v33  ;;  %v1085_v52 = vld [vmem:[%s345_s12] sm:%s1084_s0] }
  0xd0   : > { %v681_v20 = vadd.f32 %v673_v58, %v661_v15  ;;  %v622_v47 = vadd.f32 %v614_v4, %v602_v7  ;;  %v462_v24 = vsel %vm423_vm0, %v448_v17, 0.0  ;;  %v485_v54 = vsel %vm480_vm2, %v472_v11, %v478_v41 }
  0xd1   : > { %v586_v36 = vadd.f32 %v578_v32, %v566_v9  ;;  %v623_v37 = vadd.f32 %v615_v30, %v603_v3  ;;  %v655_v40 = vmul.f32 %v1779_v50, %v462_v24  ;;  %v675_v33 = vmul.f32 %v1804_v2, %v1863_v53 }
  0xd2   : > { %v701_v19 = vadd.f32 %v693_v23, %v681_v20  ;;  %v642_v34 = vadd.f32 %v1866_v57, %v622_v47  ;;  %v597_v42 = vmul.f32 %v1773_v45, %v462_v24  ;;  %v442_v39 = vsel %vm437_vm1, %v429_v10, %v435_v44 }
  0xd3   : > { %v637_v48 = vmul.f32 %v1777_v49, %v485_v54  ;;  %v643_v13 = vadd.f32 %v635_v38, %v623_v37  ;;  %v491_v5 = vsel %vm480_vm2, %v478_v41, %v472_v11  ;;  %v604_v51 = vadd.f32 %v596_v25, %v1894_v21 }
  0xd4   : > { %709 = vst [vmem:[%s1891_s13 + $0x10] sm:$0xff] %v701_v19  ;;  %v662_v56 = vadd.f32 %v654_v43, %v642_v34  ;;  %v695_v61 = vmul.f32 %v1808_v22, %v485_v54  ;;  %v598_v57 = vmul.f32 %v1773_v45, %v442_v39  ;;  %v616_v55 = vmul.f32 %v1775_v46, %v1826_v14 }
  0xd5   : > { %v663_v59 = vadd.f32 %v655_v40, %v643_v13  ;;  %v506_v38 = vsel %vm467_vm3, %v491_v5, 0.0  ;;  %v656_v8 = vmul.f32 %v1779_v50, %v442_v39  ;;  %v676_v21 = vmul.f32 %v1804_v2, %v1904_v35 }
  0xd6   : > { %v682_v58 = vadd.f32 %v674_v63, %v662_v56  ;;  %v624_v23 = vadd.f32 %v616_v55, %v604_v51  ;;  %v430_v27 = vrot.slane %v1085_v52, 7  ;;  %v436_v45 = vrot.slane %v1088_v62, 7 }
  0xd7   : > { %v683_v31 = vadd.f32 %v675_v33, %v663_v59  ;;  %v473_v28 = vrot.slane %v1085_v52, 1  ;;  %v479_v14 = vrot.slane %v1088_v62, 1  ;;  %v605_v32 = vadd.f32 %v597_v42, %v585_v6 }
  0xd8   : > { %v702_v60 = vadd.f32 %v694_v16, %v682_v58  ;;  %v644_v12 = vadd.f32 %v636_v29, %v624_v23  ;;  %v617_v25 = vmul.f32 %v1775_v46, %v1863_v53  ;;  %v638_v0 = vmul.f32 %v1777_v49, %v506_v38 }
  0xd9   : > { %v703_v4 = vadd.f32 %v695_v61, %v683_v31  ;;  %v696_v18 = vmul.f32 %v1808_v22, %v506_v38  ;;  %v449_v43 = vsel %vm437_vm1, %v436_v45, %v430_v27  ;;  %v486_v6 = vsel %vm480_vm2, %v473_v28, %v479_v14 }
  0xda   : > { %710 = vst [vmem:[%s1891_s13 + $0x18] sm:$0xff] %v702_v60  ;;  %v664_v9 = vadd.f32 %v656_v8, %v644_v12  ;;  %v464_v10 = vsel %vm423_vm0, %v449_v43, 0.0  ;;  %v625_v29 = vadd.f32 %v617_v25, %v605_v32  ;;  %v677_v49 = vmul.f32 %v1085_v52, %v1804_v2 }
  0xdb   : > { %711 = vst [vmem:[%s1891_s13 + $0x20] sm:$0xff] %v703_v4  ;;  %v657_v53 = vmul.f32 %v1779_v50, %v464_v10  ;;  %v443_v44 = vsel %vm437_vm1, %v430_v27, %v436_v45  ;;  %v606_v11 = vadd.f32 %v598_v57, %v586_v36  ;;  %v492_v63 = vsel %vm480_vm2, %v479_v14, %v473_v28 }
  0xdc   : > { %v684_v15 = vadd.f32 %v676_v21, %v664_v9  ;;  %v645_v7 = vadd.f32 %v637_v48, %v625_v29  ;;  %v618_v41 = vmul.f32 %v1775_v46, %v1904_v35  ;;  %v697_v16 = vmul.f32 %v1808_v22, %v486_v6 }
  0xdd   : > { %v658_v20 = vmul.f32 %v1779_v50, %v443_v44  ;;  %v508_v47 = vsel %vm467_vm3, %v492_v63, 0.0  ;;  %v678_v46 = vmul.f32 %v1088_v62, %v1804_v2 }
  0xde   : > { %v704_v17 = vadd.f32 %v696_v18, %v684_v15  ;;  %v665_v3 = vadd.f32 %v657_v53, %v645_v7  ;;  %v626_v30 = vadd.f32 %v618_v41, %v606_v11  ;;  %v698_v36 = vmul.f32 %v1808_v22, %v508_v47 }
  0xe0   : > { %712 = vst [vmem:[%s1891_s13 + $0x28] sm:$0xff] %v704_v17  ;;  %v685_v1 = vadd.f32 %v677_v49, %v665_v3  ;;  %v646_v24 = vadd.f32 %v638_v0, %v626_v30 }
  0xe2   : > { %v705_v35 = vadd.f32 %v697_v16, %v685_v1  ;;  %v666_v54 = vadd.f32 %v658_v20, %v646_v24 }
  0xe4   : > { %713 = vst [vmem:[%s1891_s13 + $0x30] sm:$0xff] %v705_v35  ;;  %v686_v26 = vadd.f32 %v678_v46, %v666_v54 }
  0xe6   : > { %v706_v50 = vadd.f32 %v698_v36, %v686_v26 }
  0xe8   : > { %714 = vst [vmem:[%s1891_s13 + $0x38] sm:$0xff] %v706_v50 }
  0xe9   : > { %1212 = shalt.err (!%p1209_p9)
}
  0xea   : > { %s1213_s12 = scalar_lea.hbm %s2017_s8, 1024  ;;  %s1217_s29 = scalar_lea.hbm %s2181_s9, 8192 }
  0xeb   : > { %p1214_p12 = scmp.ne.s32.totalorder %s2017_s8, %s1213_s12  ;;  %p1218_p6 = scmp.lt.s32.totalorder %s2017_s8, %s2181_s9 }
  0xec   : > { %p1219_p4 = scmp.lt.s32.totalorder %s1217_s29, %s1213_s12 }
  0xed   : > { %p1215_p5 = pnand %p1214_p12, %p2182_p7 }
  0xee   : > { %p1220_p2 = por %p1219_p4, %p1218_p6 }
  0xef   : > { %p1216_p13 = pneg %p1215_p5 }
  0xf1   : > { %p1221_p1 = pnand %p1220_p2, %p1216_p13 }
  0xf3   : > { %1224 = shalt.err (!%p1221_p1)
}
  0xf4   : > { %s1366_s13 = smov 128   ;;  %s1367_s0 = smov 8  }
  0xf5   : > { %934 = dma.vmem_to_hbm [thread:$0]  (%p2182_p7), %s2011_s26, 1024, %s2017_s8, %s716_s27, %s1366_s13, %s1366_s13, %s1367_s0  }
  0xf6 PF: > { %p957_p0 = scmp.ge.s32.totalorder %s1355_s6, 2  ;;  %s747_s18 = sand.u32 1, %s1327_s24  }
  0xf7   : > { %p2183_p3 = scmp.ne.s32.totalorder %s2155_s16, 0  ;;  %s748_s4 = scalar_lea.sflag [#allocation4], %s747_s18 }
  0xf9   : > { %p951_p8 = pnand %p957_p0, %p2183_p3 }
  0xfb   : > { %p952_p10 = pneg %p951_p8 }
  0xfd   : > { %1298 = dma.done.wait (%p952_p10), %s748_s4, 1024  }
  0xfe   : > { %1300 = vsyncadd (%p952_p10), %s748_s4, 4294966272  ;;  %s25_s6 = sadd.s32 1, %s1355_s6   ;;  %s2185_s18 = sld [smem:[#allocation17_spill]] }
  0xff   : > { %p2048_p11 = scmp.ge.s32.totalorder %s25_s6, 10   ;;  %s2186_s19 = sld [smem:[#allocation18_spill]] }
 0x100   : > { %s2187_s15 = sld [smem:[#allocation19_spill]]  ;;  %s2195_s21 = smov %s1319_s22 }
 0x101   : > { %s2188_s23 = sld [smem:[#allocation29_spill]]  ;;  %s2197_s24 = smov %s1331_s25 }
 0x102   : > { %s2189_s28 = sld [smem:[#allocation20_spill]] }
 0x103   : > { %s2190_s26 = sld [smem:[#allocation30_spill]] }
 0x104   : > { %s2191_s27 = sld [smem:[#allocation23_spill]] }
 0x105   : > { %s2192_s16 = sld [smem:[#allocation24_spill]] }
 0x106   : > { %s2193_s29 = sld [smem:[#allocation25_spill]]  ;;  %s2196_s22 = smov %s2187_s15 }
 0x107   : > { %s2194_s30 = sld [smem:[#allocation26_spill]]  ;;  %24 = sbr.rel (!%p2048_p11) target bundleno = 20 (0x14), region = 113 }
 0x108   : > { %s2198_s25 = smov %s2189_s28 }
 0x10b   : > { %s2199_s28 = smov %s2192_s16 }
 0x10c   :  { %753 = vsyncpa [#allocation3], 1 }
 0x10d   :  { %755 = vsyncpa [#allocation3 + $0x1], 1 }
 0x10e   :  { %756 = vsyncpa [#allocation6], 1 }
 0x10f   :  { %758 = vsyncpa [#allocation6 + $0x1], 1 }
 0x110   :  { %759 = vsyncpa [#allocation9], 1 }
 0x111   :  { %760 = vsyncpa [#allocation4], 1 }
 0x112   :  { %762 = vsyncpa [#allocation4 + $0x1], 1 }

</bundles_post_ra>
